<compile_context>
chip_gen: v7x
topology: tpu7x:2x2x1
jax: 0.10.0
libtpu: 0.0.40
codegen_flags: <defaults>
</compile_context>

<pallas_src>
import functools

import numpy as np
import jax
import jax.numpy as jnp
from jax.experimental import pallas as pl
from jax.experimental.pallas import tpu as pltpu


# ----------------------------------------------------------------------------
# Deterministic parameter construction (mirrors the PyTorch __init__ semantics)
# ----------------------------------------------------------------------------
def gram_schmidt_np(vs: np.ndarray) -> np.ndarray:
    """vs: (n, d) rows -> orthonormal rows (classical Gram-Schmidt, like the
    PyTorch reference: subtract projections onto previous outputs, L2-norm)."""
    out = []
    for x in vs:
        x = x.astype(np.float64).copy()
        for y in out:
            x = x - (np.dot(y, x) / np.dot(y, y)) * y
        x = x / np.linalg.norm(x)
        out.append(x)
    return np.stack(out)


def initialize_orthogonal_filters_np(c: int, h: int, w: int,
                                     rng: np.random.Generator) -> np.ndarray:
    """Replicates initialize_orthogonal_filters(c, h, w).view(c, h, w)."""
    if h * w < c:
        n = c // (h * w)
        grams = [gram_schmidt_np(rng.random((h * w, h * w))) for _ in range(n)]
        filt = np.concatenate(grams, axis=0)
    else:
        filt = gram_schmidt_np(rng.random((c, h * w)))
    return filt.reshape(c, h, w).astype(np.float32)


def _adaptive_pool_matrix(in_size: int, out_size: int) -> np.ndarray:
    """PyTorch adaptive_avg_pool2d bin-averaging matrix (out_size, in_size)."""
    P = np.zeros((out_size, in_size), np.float32)
    for i in range(out_size):
        s = (i * in_size) // out_size
        e = -(-((i + 1) * in_size) // out_size)  # ceil
        P[i, s:e] = 1.0 / (e - s)
    return P


# ----------------------------------------------------------------------------
# Pallas kernels
# ----------------------------------------------------------------------------
def oca_fused_kernel(x_ref, filt_ref, w1_ref, w2_ref, out_ref):
    # x_ref   : (b_tile, C, HW)  native dtype
    # filt_ref: (C, HW)          f32 orthogonal filters (flattened)
    # w1_ref  : (C, Cr) f32, w2_ref: (Cr, C) f32 (pre-transposed Linear weights)
    x = x_ref[...].astype(jnp.float32)                         # upcast in-register
    filt = filt_ref[...]
    # compressed[b, c] = sum_hw filter[c, hw] * x[b, c, hw]
    compressed = jnp.sum(x * filt[None, :, :], axis=-1)        # (b_tile, C)
    # channel_attention: Linear -> ReLU -> Linear -> Sigmoid (tiny; rides free)
    hidden = jnp.maximum(
        jnp.dot(compressed, w1_ref[...], preferred_element_type=jnp.float32), 0.0)
    excitation = jax.nn.sigmoid(
        jnp.dot(hidden, w2_ref[...], preferred_element_type=jnp.float32))
    out_ref[...] = (x * excitation[:, :, None]).astype(out_ref.dtype)


def oca_compress_kernel(x_ref, filt_ref, comp_ref):
    # Fallback pass 1: accumulate compressed[b, c] over HW tiles.
    @pl.when(pl.program_id(1) == 0)
    def _():
        comp_ref[...] = jnp.zeros_like(comp_ref)
    x = x_ref[...].astype(jnp.float32)                         # (1, C, hw_tile)
    comp_ref[...] += jnp.sum(x * filt_ref[...][None, :, :], axis=-1, keepdims=True)


def oca_rescale_kernel(x_ref, exc_ref, out_ref):
    # Fallback pass 2: out = x * excitation (broadcast over the HW/lane axis).
    x = x_ref[...].astype(jnp.float32)                         # (1, C, hw_tile)
    out_ref[...] = (x * exc_ref[...]).astype(out_ref.dtype)    # exc: (1, C, 1)


# ----------------------------------------------------------------------------
# Tiling helpers
# ----------------------------------------------------------------------------
def _scoped_vmem_bytes() -> int:
    """Scoped VMEM we request: half of physical (64 MiB v5e/v6e, 32 MiB v7x)."""
    try:
        cap = pltpu.get_tpu_info().vmem_capacity_bytes
    except Exception:
        cap = 64 * 1024 * 1024   # conservative fallback (v7x per-core VMEM)
    return cap // 2


def _pick_b_tile(B: int, per_row_bytes: int, budget_bytes: int,
                 min_steps: int = 4) -> int:
    """Largest divisor of B that fits the budget, while keeping >= min_steps grid
    steps when the batch allows (feeds both v7x TensorCores; ~0.35us/step)."""
    max_bt = max(1, budget_bytes // per_row_bytes)
    bt = max(1, min(B, max_bt))
    if B > 1:
        bt = min(bt, max(1, B // min_steps))
    while B % bt:
        bt -= 1
    return bt


def _largest_divisor_leq(n: int, cap: int, multiple: int = 1):
    cap = min(n, cap)
    d = (cap // multiple) * multiple
    while d >= multiple:
        if n % d == 0:
            return d
        d -= multiple
    return None


# ----------------------------------------------------------------------------
# Forward wrapper
# ----------------------------------------------------------------------------
@functools.partial(jax.jit,
                   static_argnames=("height", "b_tile", "hw_tile", "force_two_pass"))
def orthogonal_channel_attention(x, constant_filter, w1_t, w2_t, *, height,
                                 b_tile=None, hw_tile=None, force_two_pass=False):
    """x: (B, C, H, W). Returns (B, C, height, height) in x.dtype, matching the
    PyTorch forward (pools x to (height, height) if needed, then rescales it)."""
    B, C, H, W = x.shape
    if H != height or W != height:
        # General adaptive_avg_pool2d via separable bin-averaging matrices
        # (host-side glue, exact PyTorch semantics incl. non-divisible sizes).
        Ph = jnp.asarray(_adaptive_pool_matrix(H, height))
        Pw = jnp.asarray(_adaptive_pool_matrix(W, height))
        x = jnp.einsum("oh,bchw,pw->bcop", Ph, x.astype(jnp.float32), Pw).astype(x.dtype)
        H = W = height

    HW = H * W
    Cr = w1_t.shape[1]
    x_flat = x.reshape(B, C, HW)                              # native dtype, no padding
    filt_flat = constant_filter.reshape(C, HW).astype(jnp.float32)
    w1 = w1_t.astype(jnp.float32)
    w2 = w2_t.astype(jnp.float32)

    isz = x.dtype.itemsize
    row_native = C * HW * isz
    row_f32 = C * HW * 4
    scoped_vmem = _scoped_vmem_bytes()
    slack = 2 * 1024 * 1024

    def cparams(sem):
        return pltpu.CompilerParams(dimension_semantics=sem,
                                    vmem_limit_bytes=scoped_vmem)

    # ---- fused single-pass path -------------------------------------------
    # VMEM per batch row: double-buffered x + out blocks (native dtype) plus an
    # in-kernel f32 working set; constant blocks charged separately (filter is
    # double-buffered by the pipeline even though it is fetched once).
    const_bytes = 2 * (C * HW * 4) + 4 * (C * Cr * 4)
    fused_budget = scoped_vmem - const_bytes - slack
    per_row = 4 * row_native + 4 * row_f32
    use_fused = (not force_two_pass) and fused_budget >= per_row

    if use_fused:
        bt = b_tile if b_tile is not None else _pick_b_tile(B, per_row, fused_budget)
        assert B % bt == 0, "b_tile must divide the batch size"
        out_flat = pl.pallas_call(
            oca_fused_kernel,
            out_shape=jax.ShapeDtypeStruct((B, C, HW), x.dtype),
            grid_spec=pltpu.PrefetchScalarGridSpec(
                num_scalar_prefetch=0,
                grid=(B // bt,),
                in_specs=[
                    pl.BlockSpec((bt, C, HW), lambda b: (b, 0, 0)),   # x (full C, HW)
                    pl.BlockSpec((C, HW), lambda b: (0, 0)),          # filters
                    pl.BlockSpec((C, Cr), lambda b: (0, 0)),          # w1^T
                    pl.BlockSpec((Cr, C), lambda b: (0, 0)),          # w2^T
                ],
                out_specs=pl.BlockSpec((bt, C, HW), lambda b: (b, 0, 0)),
            ),
            input_output_aliases={0: 0},   # pure overwrite of x -> reuse HBM buffer
            compiler_params=cparams(("parallel",)),
        )(x_flat, filt_flat, w1, w2)
        return out_flat.reshape(B, C, H, W)

    # ---- two-pass fallback: one batch row is too big for VMEM --------------
    fb_budget = scoped_vmem - slack
    bytes_per_hw = C * max(2 * isz + 8 + 8,   # compress: x dbuf + filt dbuf + f32 temps
                           4 * isz + 8)       # rescale : x+out dbuf + f32 temps
    if hw_tile is None:
        cap = max(1, fb_budget // bytes_per_hw)
        hw_tile = _largest_divisor_leq(HW, cap, multiple=128)
        if hw_tile is None:
            # TODO(synk): no lane-aligned divisor of HW <= cap; fall back to any divisor.
            hw_tile = _largest_divisor_leq(HW, cap, multiple=1)
    assert HW % hw_tile == 0

    # Pass 1: compressed[b, c] accumulated over HW tiles (output block resident
    # across the "arbitrary" hw axis; init via pl.when on the first tile).
    compressed3 = pl.pallas_call(
        oca_compress_kernel,
        out_shape=jax.ShapeDtypeStruct((B, C, 1), jnp.float32),
        grid_spec=pltpu.PrefetchScalarGridSpec(
            num_scalar_prefetch=0,
            grid=(B, HW // hw_tile),
            in_specs=[
                pl.BlockSpec((1, C, hw_tile), lambda b, h: (b, 0, h)),
                pl.BlockSpec((C, hw_tile), lambda b, h: (0, h)),
            ],
            out_specs=pl.BlockSpec((1, C, 1), lambda b, h: (b, 0, 0)),
        ),
        compiler_params=cparams(("parallel", "arbitrary")),
    )(x_flat, filt_flat)

    # Tiny (B, C) squeeze/excite MLP: plain JAX (negligible next to streaming x).
    compressed = compressed3[:, :, 0]
    excitation = jax.nn.sigmoid(jax.nn.relu(compressed @ w1) @ w2)[:, :, None]

    # Pass 2: out = x * excitation, streamed in HW tiles, aliased onto x.
    out_flat = pl.pallas_call(
        oca_rescale_kernel,
        out_shape=jax.ShapeDtypeStruct((B, C, HW), x.dtype),
        grid_spec=pltpu.PrefetchScalarGridSpec(
            num_scalar_prefetch=0,
            grid=(B, HW // hw_tile),
            in_specs=[
                pl.BlockSpec((1, C, hw_tile), lambda b, h: (b, 0, h)),
                pl.BlockSpec((1, C, 1), lambda b, h: (b, 0, 0)),
            ],
            out_specs=pl.BlockSpec((1, C, hw_tile), lambda b, h: (b, 0, h)),
        ),
        input_output_aliases={0: 0},
        compiler_params=cparams(("parallel", "parallel")),
    )(x_flat, excitation)
    return out_flat.reshape(B, C, H, W)


# ----------------------------------------------------------------------------
# Pure-JAX reference (for x already at (height, height))
# ----------------------------------------------------------------------------
def reference(x, constant_filter, w1_t, w2_t):
    compressed = jnp.sum(constant_filter[None] * x, axis=(-1, -2))   # (B, C)
    hidden = jax.nn.relu(compressed @ w1_t)
    excitation = jax.nn.sigmoid(hidden @ w2_t)
    return x * excitation[:, :, None, None]


if __name__ == "__main__":
    channels, height, B = 32, 16, 4     # channels >= 16 so channels // 16 >= 1

    # Constant orthogonal filters (GramSchmidtTransform buffer), deterministic.
    np_rng = np.random.default_rng(0)
    constant_filter = jnp.asarray(
        initialize_orthogonal_filters_np(channels, height, height, np_rng))

    # Linear weights (bias=False). PyTorch computes y = x @ W.T; pre-transpose.
    key = jax.random.PRNGKey(0)
    k_x, k_w1, k_w2, k_xp = jax.random.split(key, 4)
    c_red = channels // 16
    w1 = jax.random.normal(k_w1, (c_red, channels), dtype=jnp.float32) * 0.1
    w2 = jax.random.normal(k_w2, (channels, c_red), dtype=jnp.float32) * 0.1
    w1_t, w2_t = w1.T, w2.T             # (C, Cr), (Cr, C)

    x = jax.random.normal(k_x, (B, channels, height, height), dtype=jnp.float32)
    ref = jax.block_until_ready(reference(x, constant_filter, w1_t, w2_t))

    # 1) fused single-pass path (f32 I/O).
    out = jax.block_until_ready(
        orthogonal_channel_attention(x, constant_filter, w1_t, w2_t, height=height))
    assert out.shape == x.shape and out.dtype == x.dtype
    np.testing.assert_allclose(np.asarray(out), np.asarray(ref), rtol=1e-4, atol=1e-5)

    # 2) native-dtype streaming (bf16 I/O halves HBM traffic; math is f32 in-register).
    xb = x.astype(jnp.bfloat16)
    outb = jax.block_until_ready(
        orthogonal_channel_attention(xb, constant_filter, w1_t, w2_t, height=height))
    assert outb.dtype == jnp.bfloat16
    refb = reference(xb.astype(jnp.float32), constant_filter, w1_t, w2_t)
    np.testing.assert_allclose(np.asarray(outb.astype(jnp.float32)), np.asarray(refb),
                               rtol=2e-2, atol=2e-2)

    # 3) two-pass fallback path (forced, HW tiled in 2 steps -> exercises accumulation).
    out2 = jax.block_until_ready(
        orthogonal_channel_attention(x, constant_filter, w1_t, w2_t, height=height,
                                     force_two_pass=True, hw_tile=128))
    np.testing.assert_allclose(np.asarray(out2), np.asarray(ref), rtol=1e-4, atol=1e-5)

    # 4) pooling branch (32x32 -> adaptive-avg-pool to 16x16, divisible case).
    xp = jax.random.normal(k_xp, (2, channels, 2 * height, 2 * height), jnp.float32)
    xp_pooled = xp.reshape(2, channels, height, 2, height, 2).mean(axis=(3, 5))
    refp = reference(xp_pooled, constant_filter, w1_t, w2_t)
    outp = jax.block_until_ready(
        orthogonal_channel_attention(xp, constant_filter, w1_t, w2_t, height=height))
    assert outp.shape == (2, channels, height, height)
    np.testing.assert_allclose(np.asarray(outp), np.asarray(refp), rtol=1e-4, atol=1e-5)

    print("KERNEL_OK")
</pallas_src>

<mosaic_0001>
module attributes {stable_mosaic.version = 11 : i64} {
  func.func @oca_fused_kernel(%arg0: i32, %arg1: memref<1x32x256xf32, #tpu.memory_space<vmem>>, %arg2: memref<32x256xf32, #tpu.memory_space<vmem>>, %arg3: memref<32x2xf32, #tpu.memory_space<vmem>>, %arg4: memref<2x32xf32, #tpu.memory_space<vmem>>, %arg5: memref<1x32x256xf32, #tpu.memory_space<vmem>>) attributes {dimension_semantics = [#tpu.dimension_semantics<parallel>], iteration_bounds = array<i64: 4>, scalar_prefetch = 0 : i64, scratch_operands = 0 : i64, tpu.core_type = #tpu.core_type<tc>, window_params = [{transform_indices = @transform_0, window_bounds = array<i64: 1, 32, 256>}, {pipeline_mode = #tpu.pipeline_mode<synchronous>, transform_indices = @transform_1, window_bounds = array<i64: 32, 256>}, {pipeline_mode = #tpu.pipeline_mode<synchronous>, transform_indices = @transform_2, window_bounds = array<i64: 32, 2>}, {pipeline_mode = #tpu.pipeline_mode<synchronous>, transform_indices = @transform_3, window_bounds = array<i64: 2, 32>}, {transform_indices = @transform_4, window_bounds = array<i64: 1, 32, 256>}]} {
    %c0 = arith.constant 0 : index
    %c0_0 = arith.constant 0 : index
    %c0_1 = arith.constant 0 : index
    %0 = vector.load %arg1[%c0, %c0_0, %c0_1] : memref<1x32x256xf32, #tpu.memory_space<vmem>>, vector<1x32x256xf32>
    %c0_2 = arith.constant 0 : index
    %c0_3 = arith.constant 0 : index
    %1 = vector.load %arg2[%c0_2, %c0_3] : memref<32x256xf32, #tpu.memory_space<vmem>>, vector<32x256xf32>
    %2 = vector.shape_cast %1 : vector<32x256xf32> to vector<1x32x256xf32>
    %3 = arith.mulf %0, %2 : vector<1x32x256xf32>
    %cst = arith.constant dense<0.000000e+00> : vector<1x32xf32>
    %4 = vector.multi_reduction <add>, %3, %cst [2] : vector<1x32x256xf32> to vector<1x32xf32>
    %c0_4 = arith.constant 0 : index
    %c0_5 = arith.constant 0 : index
    %5 = vector.load %arg3[%c0_4, %c0_5] : memref<32x2xf32, #tpu.memory_space<vmem>>, vector<32x2xf32>
    %cst_6 = arith.constant dense<0.000000e+00> : vector<1x2xf32>
    %6 = tpu.matmul %4, %5, %cst_6 {dimension_numbers = #tpu.dot_dimension_numbers<[1], [0], [0], [1], [0, 0, 1, 1], [], []>} : vector<1x32xf32>, vector<32x2xf32>, vector<1x2xf32> -> vector<1x2xf32>
    %cst_7 = arith.constant 0.000000e+00 : f32
    %7 = vector.broadcast %cst_7 : f32 to vector<1x2xf32>
    %8 = arith.maximumf %6, %7 : vector<1x2xf32>
    %c0_8 = arith.constant 0 : index
    %c0_9 = arith.constant 0 : index
    %9 = vector.load %arg4[%c0_8, %c0_9] : memref<2x32xf32, #tpu.memory_space<vmem>>, vector<2x32xf32>
    %cst_10 = arith.constant dense<0.000000e+00> : vector<1x32xf32>
    %10 = tpu.matmul %8, %9, %cst_10 {dimension_numbers = #tpu.dot_dimension_numbers<[1], [0], [0], [1], [0, 0, 1, 1], [], []>} : vector<1x2xf32>, vector<2x32xf32>, vector<1x32xf32> -> vector<1x32xf32>
    %11 = arith.negf %10 : vector<1x32xf32>
    %12 = math.exp %11 : vector<1x32xf32>
    %cst_11 = arith.constant 1.000000e+00 : f32
    %13 = vector.broadcast %cst_11 : f32 to vector<1x32xf32>
    %14 = arith.addf %13, %12 : vector<1x32xf32>
    %15 = arith.divf %13, %14 : vector<1x32xf32>
    %16 = vector.shape_cast %15 : vector<1x32xf32> to vector<1x32x1xf32>
    %17 = vector.broadcast %16 : vector<1x32x1xf32> to vector<1x32x256xf32>
    %18 = arith.mulf %0, %17 : vector<1x32x256xf32>
    %c0_12 = arith.constant 0 : index
    %c0_13 = arith.constant 0 : index
    %c0_14 = arith.constant 0 : index
    %19 = vector.load %arg5[%c0_12, %c0_13, %c0_14] : memref<1x32x256xf32, #tpu.memory_space<vmem>>, vector<1x32x256xf32>
    tpu.vector_store %arg5[%c0_12, %c0_13, %c0_14], %18 {strides = array<i32>} : memref<1x32x256xf32, #tpu.memory_space<vmem>>, vector<1x32x256xf32>,
    return
  }
  func.func @transform_0(%arg0: i32) -> (i32, i32, i32) {
    %c0_i32 = arith.constant 0 : i32
    %c0_i32_0 = arith.constant 0 : i32
    %c0_i32_1 = arith.constant 0 : i32
    return %arg0, %c0_i32, %c0_i32_0 : i32, i32, i32
  }
  func.func @transform_1(%arg0: i32) -> (i32, i32) {
    %c0_i32 = arith.constant 0 : i32
    %c0_i32_0 = arith.constant 0 : i32
    %c0_i32_1 = arith.constant 0 : i32
    return %c0_i32, %c0_i32_0 : i32, i32
  }
  func.func @transform_2(%arg0: i32) -> (i32, i32) {
    %c0_i32 = arith.constant 0 : i32
    %c0_i32_0 = arith.constant 0 : i32
    %c0_i32_1 = arith.constant 0 : i32
    return %c0_i32, %c0_i32_0 : i32, i32
  }
  func.func @transform_3(%arg0: i32) -> (i32, i32) {
    %c0_i32 = arith.constant 0 : i32
    %c0_i32_0 = arith.constant 0 : i32
    %c0_i32_1 = arith.constant 0 : i32
    return %c0_i32, %c0_i32_0 : i32, i32
  }
  func.func @transform_4(%arg0: i32) -> (i32, i32, i32) {
    %c0_i32 = arith.constant 0 : i32
    %c0_i32_0 = arith.constant 0 : i32
    %c0_i32_1 = arith.constant 0 : i32
    return %arg0, %c0_i32, %c0_i32_0 : i32, i32, i32
  }
}

</mosaic_0001>

<bundles_post_ra>
// kernel: orthogonal_channel_attention.1
= control target key start
LH: loop header
LB: loop body
LE: loop exit
PB: predicated region body
PF: predicated region fallthrough
CT: control target
= control target key end

     0   :  { %s615_s15 = smov 0   ;;  %s710_s0 = inlined_call_operand.vmem [shape: f32[4,32,256], index: 0, kind: input, shape index: {}, may-alias: {0,4}]   ;;  %s711_s1 = inlined_call_operand.vmem [shape: f32[32,256], index: 1, kind: input, shape index: {}]   ;;  %s712_s2 = inlined_call_operand.vmem [shape: f32[32,2], index: 2, kind: input, shape index: {}]   ;;  %s713_s3 = inlined_call_operand.vmem [shape: f32[2,32], index: 3, kind: input, shape index: {}]   ;;  %s714_s4 = inlined_call_operand.vmem [shape: f32[4,32,256], index: 4, kind: output, shape index: {}, may-alias: {0,4}]  }
   0x1 LB: > { %s518_s16 = sadd.s32 4294967295, %s585_s15   ;;  %p522_p0 = scmp.ge.s32.totalorder %s585_s15, 1  ;;  %s585_s15 = sphi %s615_s15, %s14_s15  }
   0x2   : > { %p162_p1 = scmp.lt.s32.totalorder %s585_s15, 5 }
   0x4   : > { %p163_p2 = pnand %p522_p0, %p162_p1 }
   0x5   : > { %p188_p3 = scmp.lt.s32.totalorder (!%p163_p2), %s518_s16, 3  ;;  %v206_v0 = vld [vmem:[%s711_s1] sm:$0xff] (!%p163_p2)  ;;  %v207_v1 = vld [vmem:[%s711_s1 + $0x8] sm:$0xff] (!%p163_p2)  ;;  %v208_v4 = vld [vmem:[%s711_s1 + $0x10] sm:$0xff] (!%p163_p2)  ;;  %v587_v31 = vmov (!%p163_p2), 0.0|0.0   ;;  %vm588_vm0 = vmmov (!%p163_p2), 0   ;;  %v242_v36 = vlaneseq (!%p163_p2) }
   0x6   : > { %166 = sbr.rel (%p163_p2) target bundleno = 752 (0x2f0), region = 36  ;;  %v210_v2 = vld [vmem:[%s711_s1 + $0x20] sm:$0xff] (!%p163_p2)  ;;  %v211_v3 = vld [vmem:[%s711_s1 + $0x28] sm:$0xff] (!%p163_p2)  ;;  %v209_v5 = vld [vmem:[%s711_s1 + $0x18] sm:$0xff] (!%p163_p2)  ;;  %558 = vmatprep.subr.bf16.mxu0 (!%p163_p2), %v587_v31  ;;  %v589_v35 = vmov (!%p163_p2), 0.0   ;;  %vm253_vm1 = vcmask (!%p163_p2), 130112  }
   0x7   : > { %v212_v6 = vld [vmem:[%s711_s1 + $0x30] sm:$0xff] (!%p163_p2)  ;;  %v213_v7 = vld [vmem:[%s711_s1 + $0x38] sm:$0xff] (!%p163_p2)  ;;  %v234_v28 = vld [vmem:[%s712_s2] sm:$0xff] (!%p163_p2)  ;;  %550 = vmatprep.mubr.msk.f32.mxu0 (!%p163_p2), %vm588_vm0, %v589_v35  ;;  %553 = vmatprep.subr.mxu1 (!%p163_p2), %v589_v35  ;;  %v243_v37 = vand.u32 (!%p163_p2), 127, %v242_v36  ;;  %v245_v38 = vshrl.u32 (!%p163_p2), %v242_v36, 7  ;;  %vm260_vm2 = vcmask (!%p163_p2), 195712  }
   0x8   : > { %v235_v29 = vld [vmem:[%s712_s2 + $0x8] sm:$0xff] (!%p163_p2)  ;;  %v236_v32 = vld [vmem:[%s712_s2 + $0x10] sm:$0xff] (!%p163_p2)  ;;  %v237_v33 = vld [vmem:[%s712_s2 + $0x18] sm:$0xff] (!%p163_p2)  ;;  %555 = vmatprep.mubr.msk.f32.mxu1 (!%p163_p2), %vm588_vm0, %v589_v35  ;;  %vm267_vm3 = vcmask (!%p163_p2), 261312   ;;  %vm269_vm4 = vcmask (!%p163_p2), 261120   ;;  %vm348_vm5 = vcmask (!%p163_p2), 1041408  }
   0x9   : > { %v559_v30 = vpack.c.bf16 (!%p163_p2), %v235_v29, %v234_v28  ;;  %v562_v34 = vpack.c.bf16 (!%p163_p2), %v237_v33, %v236_v32  ;;  %v248_v39 = vadd.s32 (!%p163_p2), 4294967288, %v243_v37  ;;  %v255_v40 = vadd.s32 (!%p163_p2), 4294967280, %v243_v37  ;;  %v343_v57 = vld [vmem:[%s713_s3] sm:$0x3] (!%p163_p2) }
   0xa   : > { %v262_v41 = vadd.s32 (!%p163_p2), 4294967272, %v243_v37  ;;  %v246_v43 = vsub.s32 (!%p163_p2), %v243_v37, %v245_v38  ;;  %554 = vmatpush3.msk.msra.mxu1 (!%p163_p2), %vm348_vm5, %v343_v57  ;;  %vm344_vm6 = vcmask (!%p163_p2), 15360  }
   0xb   : > { %560 = vmatpush3.bf16.msra.mxu0 (!%p163_p2), %v559_v30  ;;  %v251_v45 = vsub.s32 (!%p163_p2), %v248_v39, %v245_v38  ;;  %v258_v46 = vsub.s32 (!%p163_p2), %v255_v40, %v245_v38 }
   0xc   : > { %561 = vmatprep.subr.bf16.mxu0 (!%p163_p2), %v587_v31  ;;  %v265_v47 = vsub.s32 (!%p163_p2), %v262_v41, %v245_v38 }
   0xd   : > { %s716_s16 = smov (!%p188_p3, %s518_s16), 3 }
   0xe   : > { %s533_s21 = sshll.u32 %s716_s16, 6 }
   0xf   : > { %s192_s30 = scalar_lea.vmem %s710_s0, %s533_s21  ;;  %563 = vmatpush3.bf16.msra.mxu0 %v562_v34  ;;  %s197_s26 = scalar_lea.vmem %s714_s4, %s533_s21 }
  0x10   : > { %v655_v8 = vld [vmem:[%s192_s30] sm:$0xff]  ;;  %v657_v9 = vld [vmem:[%s192_s30 + $0x8] sm:$0xff]  ;;  %v666_v15 = vld [vmem:[%s192_s30 + $0x10] sm:$0xff] }
  0x11   : > { %v659_v10 = vld [vmem:[%s192_s30 + $0x20] sm:$0xff]  ;;  %v214_v11 = vmul.f32 %v206_v0, %v655_v8  ;;  %v215_v12 = vmul.f32 %v207_v1, %v657_v9  ;;  %v663_v13 = vld [vmem:[%s192_s30 + $0x28] sm:$0xff]  ;;  %v668_v16 = vld [vmem:[%s192_s30 + $0x18] sm:$0xff]  ;;  %v216_v18 = vmul.f32 %v208_v4, %v666_v15 }
  0x12   : > { %v218_v14 = vmul.f32 %v210_v2, %v659_v10  ;;  %v219_v17 = vmul.f32 %v211_v3, %v663_v13  ;;  %v217_v19 = vmul.f32 %v209_v5, %v668_v16  ;;  %v673_v20 = vld [vmem:[%s192_s30 + $0x30] sm:$0xff]  ;;  %v675_v21 = vld [vmem:[%s192_s30 + $0x38] sm:$0xff]  ;;  %v430_v2 = vsub.s32 0, %v245_v38 }
  0x13   : > { %v222_v22 = vadd.f32 %v215_v12, %v214_v11  ;;  %v220_v23 = vmul.f32 %v212_v6, %v673_v20  ;;  %v221_v24 = vmul.f32 %v213_v7, %v675_v21 }
  0x14   : > { %v228_v25 = vadd.f32 %v219_v17, %v218_v14  ;;  %v225_v26 = vadd.f32 %v217_v19, %v216_v18 }
  0x15   : > { %223 = vadd.xlane.f32.xlu0 %v222_v22  ;;  %v231_v27 = vadd.f32 %v221_v24, %v220_v23 }
  0x16   : > { %229 = vadd.xlane.f32.xlu1 %v228_v25 }
  0x19   : > { %226 = vadd.xlane.f32.xlu0 %v225_v26 }
  0x1a   : > { %232 = vadd.xlane.f32.xlu1 %v231_v27 }
  0xa2   : > { %v224_v42 = vpop.xlane.xlu0 %223 }
  0xa3   : > { %v230_v44 = vpop.xlane.xlu1 %229  ;;  %v247_v49 = vrot.slane %v224_v42, %v246_v43 }
  0xa4   : > { %v259_v52 = vrot.slane %v230_v44, %v258_v46 }
  0xa6   : > { %v227_v48 = vpop.xlane.xlu0 %226 }
  0xa7   : > { %v252_v50 = vrot.slane %v227_v48, %v251_v45  ;;  %v233_v51 = vpop.xlane.xlu1 %232 }
  0xa8   : > { %v266_v53 = vrot.slane %v233_v51, %v265_v47 }
  0xa9   : > { %v254_v54 = vsel %vm253_vm1, %v252_v50, %v247_v49 }
  0xaa   : > { %v261_v55 = vsel %vm260_vm2, %v259_v52, %v254_v54 }
  0xab   : > { %v268_v56 = vsel %vm267_vm3, %v266_v53, %v261_v55 }
  0xac   : > { %551 = vmatmul.mubr.msk.f32.vlgmr.msra.gmra.mrb[0].mxu0 %vm269_vm4, %v268_v56 }
 0x17f   : > { %v338_v58 = vpop.f32.mrb[0].mxu0 }
 0x180   : > { %v342_v59 = vmax.f32 %v338_v58, 0.0  ;;  %v552_v60 = vpop.f32.mrb[1].mxu0 }
 0x182   : > { %556 = vmatmul.mubr.msk.f32.vlgmr.msra.gmra.mrb[0].mxu1 %vm344_vm6, %v342_v59 }
 0x255   : > { %v418_v61 = vpop.f32.mrb[0].mxu1 }
 0x256   : > { %v530_v62 = vmul.f32 -1.442695, %v418_v61  ;;  %v557_v63 = vpop.f32.mrb[1].mxu1 }
 0x258   : > { %575 = vpow2.f32 %v530_v62 }
 0x262   : > { %v576_v0 = vpop.eup %575 }
 0x263   : > { %v425_v1 = vadd.f32 1.0, %v576_v0 }
 0x265   : > { %577 = vrcp.f32 %v425_v1 }
 0x26f   : > { %v578_v3 = vpop.eup %577 }
 0x270   : > { %v431_v4 = vrot.slane %v578_v3, %v430_v2 }
 0x272   : > { %437 = vbcast.lane.b32.xlu1 %v431_v4, 264  ;;  %433 = vbcast.lane.b32.xlu0 %v431_v4, 256 }
 0x276   : > { %441 = vbcast.lane.b32.xlu1 %v431_v4, 272 }
 0x27a   : > { %445 = vbcast.lane.b32.xlu1 %v431_v4, 280 }
 0x2e4   : > { %v438_v5 = vpop.permute.xlu1 %437  ;;  %v434_v6 = vpop.permute.xlu0 %433 }
 0x2e5   : > { %v449_v7 = vmul.f32 %v438_v5, %v666_v15  ;;  %v450_v11 = vmul.f32 %v438_v5, %v668_v16  ;;  %v447_v12 = vmul.f32 %v434_v6, %v655_v8  ;;  %v448_v14 = vmul.f32 %v434_v6, %v657_v9 }
 0x2e7   : > { %457 = vst [vmem:[%s197_s26 + $0x10] sm:$0xff] %v449_v7  ;;  %458 = vst [vmem:[%s197_s26 + $0x18] sm:$0xff] %v450_v11 }
 0x2e8   : > { %455 = vst [vmem:[%s197_s26] sm:$0xff] %v447_v12  ;;  %456 = vst [vmem:[%s197_s26 + $0x8] sm:$0xff] %v448_v14  ;;  %v442_v17 = vpop.permute.xlu1 %441 }
 0x2e9   : > { %v451_v18 = vmul.f32 %v442_v17, %v659_v10  ;;  %v452_v19 = vmul.f32 %v442_v17, %v663_v13 }
 0x2eb   : > { %459 = vst [vmem:[%s197_s26 + $0x20] sm:$0xff] %v451_v18  ;;  %460 = vst [vmem:[%s197_s26 + $0x28] sm:$0xff] %v452_v19 }
 0x2ec   : > { %v446_v22 = vpop.permute.xlu1 %445 }
 0x2ed   : > { %v453_v15 = vmul.f32 %v446_v22, %v673_v20  ;;  %v454_v16 = vmul.f32 %v446_v22, %v675_v21 }
 0x2ef   : > { %461 = vst [vmem:[%s197_s26 + $0x30] sm:$0xff] %v453_v15  ;;  %462 = vst [vmem:[%s197_s26 + $0x38] sm:$0xff] %v454_v16 }
 0x2f0 PF: > { %s14_s15 = sadd.s32 1, %s585_s15  }
 0x2f1   : > { %p11_p4 = scmp.ge.s32.totalorder %s14_s15, 6  }
 0x2f3   :  { %13 = sbr.rel (!%p11_p4) target bundleno = 1 (0x1), region = 66 }

</bundles_post_ra>
